<compile_context>
chip_gen: v6e
topology: v6e:2x2x1
jax: 0.10.0
libtpu: 0.0.40
codegen_flags: <defaults>
</compile_context>

<pallas_src>
import re

import jax
import jax.numpy as jnp
from jax.experimental import pallas as pl
from jax.experimental.pallas import tpu as pltpu

# qdtype is int8 -> torch_dtype_range(torch.int8) == (-128, 127)
QCLAMP_MIN = -128.0
QCLAMP_MAX = 127.0


def _round_up(x, m):
    return ((x + m - 1) // m) * m


def _choose_tile(dim, preferred, granule):
    """Largest tile <= preferred that is a multiple of `granule` and divides `dim`,
    falling back to the full dimension (always a legal block shape)."""
    if dim <= preferred or dim % granule != 0:
        return dim
    t = (preferred // granule) * granule
    while t >= granule:
        if dim % t == 0:
            return t
        t -= granule
    return dim


def _tpu_generation():
    try:
        kind = jax.devices()[0].device_kind.lower()
    except Exception:
        return None
    m = re.search(r"(\d+)", kind)
    return int(m.group(1)) if m else None


def _vmem_capacity_bytes():
    try:
        info = pltpu.get_tpu_info()
        cap = getattr(info, "vmem_capacity_bytes", None)
        if cap:
            return int(cap)
    except Exception:
        pass
    return 64 * 1024 * 1024  # conservative default (v7x per-TC VMEM)


def _vmem_footprint(tm, tn, tk, k_pad, cache_bytes):
    return (2 * tm * tk * 4          # x f32 double buffer
            + 2 * tk * tn            # int8 weight double buffer
            + 2 * tm * tn * 4        # f32 output double buffer
            + tm * tn * 4            # accumulator scratch
            + tm * k_pad * cache_bytes   # quantized-x cache (covers all of K)
            + 4 * 2 * tn * 4)        # scale + bias double buffers (tiny)


def _make_kernel(use_int8_mxu, nk):
    acc_t = jnp.int32 if use_int8_mxu else jnp.float32
    cache_t = jnp.int8 if use_int8_mxu else jnp.bfloat16

    def kernel(scale_in_ref, x_ref, wq_ref, scale_ref, bias_ref, o_ref,
               acc_ref, xq_ref):
        # grid = (M tiles, N tiles, K tiles); K (reduction) innermost.
        # scale_in_ref: SMEM (1,) f32 = input_scale
        # x_ref:     (tm, tk) f32 activation slab (only read at j == 0)
        # wq_ref:    (tk, tn) int8 quantized weight (transposed)
        # scale_ref: (1, tn)  f32 combined dequant scale = weight_scale * input_scale
        # bias_ref:  (1, tn)  f32 bias
        # acc_ref:   (tm, tn) int32 (int8-MXU path) or f32 accumulator
        # xq_ref:    (K//tk, tm, tk) int8/bf16 quantized-activation cache (per M tile)
        j = pl.program_id(1)
        k = pl.program_id(2)

        @pl.when(k == 0)
        def _():
            acc_ref[...] = jnp.zeros_like(acc_ref)

        # Quantize this activation slab once per (M-tile, K-tile); the cache is
        # reused for every later N tile.  trunc(clip(x/s)) == torch clamp().to(int8)
        # round-toward-zero semantics.
        @pl.when(j == 0)
        def _():
            s = scale_in_ref[0]
            xq = jnp.trunc(jnp.clip(x_ref[...] / s, QCLAMP_MIN, QCLAMP_MAX))
            xq_ref[k] = xq.astype(cache_t)

        lhs = xq_ref[k]
        rhs = wq_ref[...]
        if use_int8_mxu:
            # v5e/v6e: native int8 MXU (~2x bf16), exact int32 accumulation.
            acc_ref[...] += jnp.dot(lhs, rhs, preferred_element_type=jnp.int32)
        else:
            # v7x / unknown: bf16 MXU; int8-grid values are exactly representable
            # in bf16, f32 accumulation.
            acc_ref[...] += jnp.dot(lhs.astype(jnp.bfloat16),
                                    rhs.astype(jnp.bfloat16),
                                    preferred_element_type=jnp.float32)

        @pl.when(k == nk - 1)
        def _():
            acc = acc_ref[...].astype(jnp.float32)
            o_ref[...] = acc * scale_ref[...] + bias_ref[...]

    return kernel, acc_t, cache_t


def quant_linear(x2d, wq_t_int8, combined_scale, bias2d, input_scale,
                 *, tm=None, tn=None, tk=None, use_int8_mxu=None):
    M, K = x2d.shape
    Kw, N = wq_t_int8.shape
    assert K == Kw
    assert wq_t_int8.dtype == jnp.int8

    gen = _tpu_generation()
    if use_int8_mxu is None:
        # Native int8 MXU on v5e/v6e; v7x has no integer MXU datapath (and fp8
        # cannot represent the int8 grid exactly) -> bf16 there and on unknown parts.
        use_int8_mxu = gen in (5, 6)

    # Pad K and N up to multiples of 128 so every block is lane-dense (unmasked
    # stores, filled MXU).  Zero padding is exact: 0 quantizes to 0 and contributes 0.
    k_pad = _round_up(K, 128)
    n_pad = _round_up(N, 128)
    if k_pad != K:
        x2d = jnp.pad(x2d, ((0, 0), (0, k_pad - K)))
        wq_t_int8 = jnp.pad(wq_t_int8, ((0, k_pad - K), (0, 0)))
    if n_pad != N:
        wq_t_int8 = jnp.pad(wq_t_int8, ((0, 0), (0, n_pad - N)))
        combined_scale = jnp.pad(combined_scale, ((0, 0), (0, n_pad - N)))
        bias2d = jnp.pad(bias2d, ((0, 0), (0, n_pad - N)))

    # ---- tile selection -------------------------------------------------------
    cache_bytes = 1 if use_int8_mxu else 2
    vmem_cap = _vmem_capacity_bytes()
    vmem_limit = min(vmem_cap - 16 * 1024 * 1024, 96 * 1024 * 1024)
    vmem_limit = max(vmem_limit, 32 * 1024 * 1024)
    tile_budget = (vmem_limit * 4) // 5

    if tm is None:
        tm = min(512, _round_up(M, 8))          # above the weight-stream roofline
    if tn is None:
        tn = _choose_tile(n_pad, 512, 128)
    if tk is None:
        tk = _choose_tile(k_pad, 2048, 128)

    # Explicit VMEM budget (the quantized-x cache covers all of K and scales with
    # tm) -- shrink tm, then tk, until it fits.  Matters on v7x's 64 MiB VMEM.
    while _vmem_footprint(tm, tn, tk, k_pad, cache_bytes) > tile_budget and tm > 64:
        tm = max(64, ((tm // 2) // 8) * 8)
    while _vmem_footprint(tm, tn, tk, k_pad, cache_bytes) > tile_budget and tk > 128:
        tk = _choose_tile(k_pad, max(128, tk // 2), 128)
    # TODO(synk): for extreme K where the cache still cannot fit, fall back to
    # per-step quantization (drop the xq cache) instead of shrinking further.

    # Megacore (2 TensorCores on v7x): ensure the "parallel" M axis has >= 2 tiles.
    if gen is not None and gen >= 7 and _round_up(M, tm) // tm < 2 and M >= 16:
        tm = max(8, _round_up(_round_up(M, 8) // 2, 8))

    m_pad = _round_up(M, tm)
    if m_pad != M:
        x2d = jnp.pad(x2d, ((0, m_pad - M), (0, 0)))

    nk = k_pad // tk
    grid = (m_pad // tm, n_pad // tn, nk)

    kernel, acc_t, cache_t = _make_kernel(use_int8_mxu, nk)

    # x is only *read* at j == 0 (the quantized cache covers later N tiles).
    # Collapse its block index to the last-fetched block for j > 0 so the f32
    # activation is DMA'd from HBM exactly once per M tile (previously it was
    # re-streamed once per N tile -- the dominant HBM stream).
    def x_index_map(i, j, k):
        return (i, jnp.where(j == 0, k, nk - 1))

    out = pl.pallas_call(
        kernel,
        out_shape=jax.ShapeDtypeStruct((m_pad, n_pad), jnp.float32),
        grid=grid,
        in_specs=[
            pl.BlockSpec(memory_space=pltpu.MemorySpace.SMEM),     # input_scale (1,)
            pl.BlockSpec((tm, tk), x_index_map),                   # x tile (f32)
            pl.BlockSpec((tk, tn), lambda i, j, k: (k, j)),        # quant weight (int8)
            pl.BlockSpec((1, tn), lambda i, j, k: (0, j)),         # dequant scale
            pl.BlockSpec((1, tn), lambda i, j, k: (0, j)),         # bias
        ],
        out_specs=pl.BlockSpec((tm, tn), lambda i, j, k: (i, j)),
        scratch_shapes=[
            pltpu.VMEM((tm, tn), acc_t),          # accumulator (int32 or f32)
            pltpu.VMEM((nk, tm, tk), cache_t),    # quantized-x cache (per M tile)
        ],
        compiler_params=pltpu.CompilerParams(
            # M tiles are independent -> sharded across TensorCores on 2-TC parts.
            # N must stay sequential per core (the cache written at j==0 is reused
            # by later j); K is the reduction axis.
            dimension_semantics=("parallel", "arbitrary", "arbitrary"),
            vmem_limit_bytes=vmem_limit,
        ),
    )(input_scale, x2d, wq_t_int8, combined_scale, bias2d)

    return out[:M, :N]


def ref_forward(x, W, bias, weight_scale, input_scale):
    """Pure-JAX reference mirroring RefQuantLinear.forward."""
    qin = jnp.clip(x / input_scale, QCLAMP_MIN, QCLAMP_MAX).astype(jnp.int8).astype(jnp.float32)
    qw = jnp.clip(W / weight_scale, QCLAMP_MIN, QCLAMP_MAX).astype(jnp.int8).astype(jnp.float32)
    qout = jnp.einsum("...k,nk->...n", qin, qw)
    scale = (weight_scale * input_scale).reshape((1,) * (qout.ndim - 1) + (-1,))
    return qout * scale + bias


if __name__ == "__main__":
    batch, seq, in_channels, out_channels = 2, 8, 32, 32

    key = jax.random.PRNGKey(0)
    k_w, k_b, k_x, k_ws = jax.random.split(key, 4)

    # nn.Linear-style deterministic init (uniform(-1/sqrt(in), 1/sqrt(in)))
    bound = 1.0 / jnp.sqrt(jnp.float32(in_channels))
    W = jax.random.uniform(k_w, (out_channels, in_channels), jnp.float32, -bound, bound)
    bias = jax.random.uniform(k_b, (out_channels,), jnp.float32, -bound, bound)

    # quant_params: per-output-channel weight scale ([out,1]), per-tensor input scale ([1])
    weight_scale = jax.random.uniform(k_ws, (out_channels, 1), jnp.float32, 0.01, 0.05)
    input_scale = jnp.array([0.02], dtype=jnp.float32)

    x = jax.random.normal(k_x, (batch, seq, in_channels), jnp.float32)

    # -------- parameter setup (plain JAX, mirrors __init__) --------
    quant_weight = jnp.clip(W / weight_scale, QCLAMP_MIN, QCLAMP_MAX).astype(jnp.int8)
    wq_t_int8 = quant_weight.T                                            # (K, N) int8
    combined_scale = (weight_scale.reshape(-1) * input_scale[0]).reshape(1, out_channels)
    bias2d = bias.reshape(1, out_channels)

    # -------- kernel call --------
    x2d = x.reshape(-1, in_channels)
    out2d = quant_linear(x2d, wq_t_int8, combined_scale, bias2d, input_scale)
    out = out2d.reshape(batch, seq, out_channels)
    jax.block_until_ready(out)

    # -------- correctness check vs pure-JAX reference --------
    expected = ref_forward(x, W, bias, weight_scale, input_scale[0])
    assert out.shape == expected.shape and out.dtype == jnp.float32
    assert jnp.allclose(out, expected, rtol=1e-5, atol=1e-5), "mismatch vs reference"

    print("KERNEL_OK")
</pallas_src>

<mosaic_0001>
module attributes {stable_mosaic.version = 11 : i64} {
  func.func @kernel(%arg0: i32, %arg1: i32, %arg2: i32, %arg3: memref<1xf32, #tpu.memory_space<smem>>, %arg4: memref<16x128xf32, #tpu.memory_space<vmem>>, %arg5: memref<128x128xi8, #tpu.memory_space<vmem>>, %arg6: memref<1x128xf32, #tpu.memory_space<vmem>>, %arg7: memref<1x128xf32, #tpu.memory_space<vmem>>, %arg8: memref<16x128xf32, #tpu.memory_space<vmem>>, %arg9: memref<16x128xf32, #tpu.memory_space<vmem>>, %arg10: memref<1x16x128xbf16, #tpu.memory_space<vmem>>) attributes {dimension_semantics = [#tpu.dimension_semantics<parallel>, #tpu.dimension_semantics<arbitrary>, #tpu.dimension_semantics<arbitrary>], iteration_bounds = array<i64: 1, 1, 1>, scalar_prefetch = 0 : i64, scratch_operands = 2 : i64, tpu.core_type = #tpu.core_type<tc>, window_params = [{transform_indices = @transform_0, window_bounds = array<i64: 1>}, {transform_indices = @transform_1, window_bounds = array<i64: 16, 128>}, {transform_indices = @transform_2, window_bounds = array<i64: 128, 128>}, {transform_indices = @transform_3, window_bounds = array<i64: 1, 128>}, {transform_indices = @transform_4, window_bounds = array<i64: 1, 128>}, {transform_indices = @transform_5, window_bounds = array<i64: 16, 128>}]} {
    %c0_i32 = arith.constant 0 : i32
    %0 = arith.cmpi eq, %arg2, %c0_i32 : i32
    %1 = arith.extui %0 : i1 to i32
    %c0_i32_0 = arith.constant 0 : i32
    %2 = arith.cmpi ne, %1, %c0_i32_0 : i32
    scf.if %2 {
      %cst_12 = arith.constant 0.000000e+00 : f32
      %18 = vector.broadcast %cst_12 : f32 to vector<16x128xf32>
      %c0_13 = arith.constant 0 : index
      %c0_14 = arith.constant 0 : index
      %19 = vector.load %arg9[%c0_13, %c0_14] : memref<16x128xf32, #tpu.memory_space<vmem>>, vector<16x128xf32>
      tpu.vector_store %arg9[%c0_13, %c0_14], %18 {strides = array<i32>} : memref<16x128xf32, #tpu.memory_space<vmem>>, vector<16x128xf32>,
    } else {
    }
    %c0_i32_1 = arith.constant 0 : i32
    %3 = arith.cmpi eq, %arg1, %c0_i32_1 : i32
    %4 = arith.extui %3 : i1 to i32
    %c0_i32_2 = arith.constant 0 : i32
    %5 = arith.cmpi ne, %4, %c0_i32_2 : i32
    scf.if %5 {
      %c0_12 = arith.constant 0 : index
      %18 = memref.load %arg3[%c0_12] : memref<1xf32, #tpu.memory_space<smem>>
      %c0_13 = arith.constant 0 : index
      %c0_14 = arith.constant 0 : index
      %19 = vector.load %arg4[%c0_13, %c0_14] : memref<16x128xf32, #tpu.memory_space<vmem>>, vector<16x128xf32>
      %20 = vector.broadcast %18 : f32 to vector<16x128xf32>
      %21 = arith.divf %19, %20 : vector<16x128xf32>
      %cst_15 = arith.constant -1.280000e+02 : f32
      %cst_16 = arith.constant 1.270000e+02 : f32
      %22 = vector.broadcast %cst_15 : f32 to vector<16x128xf32>
      %23 = arith.maximumf %22, %21 : vector<16x128xf32>
      %24 = vector.broadcast %cst_16 : f32 to vector<16x128xf32>
      %25 = arith.minimumf %24, %23 : vector<16x128xf32>
      %cst_17 = arith.constant 0.000000e+00 : f32
      %26 = vector.broadcast %cst_17 : f32 to vector<16x128xf32>
      %27 = arith.cmpf olt, %25, %26 : vector<16x128xf32>
      %28 = math.ceil %25 : vector<16x128xf32>
      %29 = math.floor %25 : vector<16x128xf32>
      %30 = arith.select %27, %28, %29 : vector<16x128xi1>, vector<16x128xf32>
      %31 = arith.truncf %30 : vector<16x128xf32> to vector<16x128xbf16>
      %32 = arith.index_cast %arg2 : i32 to index
      %c0_18 = arith.constant 0 : index
      %c0_19 = arith.constant 0 : index
      %33 = vector.load %arg10[%32, %c0_18, %c0_19] : memref<1x16x128xbf16, #tpu.memory_space<vmem>>, vector<1x16x128xbf16>
      %34 = vector.shape_cast %33 : vector<1x16x128xbf16> to vector<16x128xbf16>
      %35 = vector.shape_cast %31 : vector<16x128xbf16> to vector<1x16x128xbf16>
      tpu.vector_store %arg10[%32, %c0_18, %c0_19], %35 {strides = array<i32>} : memref<1x16x128xbf16, #tpu.memory_space<vmem>>, vector<1x16x128xbf16>,
    } else {
    }
    %6 = arith.index_cast %arg2 : i32 to index
    %c0 = arith.constant 0 : index
    %c0_3 = arith.constant 0 : index
    %7 = vector.load %arg10[%6, %c0, %c0_3] : memref<1x16x128xbf16, #tpu.memory_space<vmem>>, vector<1x16x128xbf16>
    %8 = vector.shape_cast %7 : vector<1x16x128xbf16> to vector<16x128xbf16>
    %c0_4 = arith.constant 0 : index
    %c0_5 = arith.constant 0 : index
    %9 = vector.load %arg5[%c0_4, %c0_5] : memref<128x128xi8, #tpu.memory_space<vmem>>, vector<128x128xi8>
    %c0_6 = arith.constant 0 : index
    %c0_7 = arith.constant 0 : index
    %10 = vector.load %arg9[%c0_6, %c0_7] : memref<16x128xf32, #tpu.memory_space<vmem>>, vector<16x128xf32>
    %11 = arith.sitofp %9 : vector<128x128xi8> to vector<128x128xbf16>
    %cst = arith.constant dense<0.000000e+00> : vector<16x128xf32>
    %12 = tpu.matmul %8, %11, %cst {dimension_numbers = #tpu.dot_dimension_numbers<[1], [0], [0], [1], [0, 0, 1, 1], [], []>} : vector<16x128xbf16>, vector<128x128xbf16>, vector<16x128xf32> -> vector<16x128xf32>
    %13 = arith.addf %10, %12 : vector<16x128xf32>
    %c0_8 = arith.constant 0 : index
    %c0_9 = arith.constant 0 : index
    %14 = vector.load %arg9[%c0_8, %c0_9] : memref<16x128xf32, #tpu.memory_space<vmem>>, vector<16x128xf32>
    tpu.vector_store %arg9[%c0_8, %c0_9], %13 {strides = array<i32>} : memref<16x128xf32, #tpu.memory_space<vmem>>, vector<16x128xf32>,
    %c0_i32_10 = arith.constant 0 : i32
    %15 = arith.cmpi eq, %arg2, %c0_i32_10 : i32
    %16 = arith.extui %15 : i1 to i32
    %c0_i32_11 = arith.constant 0 : i32
    %17 = arith.cmpi ne, %16, %c0_i32_11 : i32
    scf.if %17 {
      %c0_12 = arith.constant 0 : index
      %c0_13 = arith.constant 0 : index
      %18 = vector.load %arg9[%c0_12, %c0_13] : memref<16x128xf32, #tpu.memory_space<vmem>>, vector<16x128xf32>
      %c0_14 = arith.constant 0 : index
      %c0_15 = arith.constant 0 : index
      %19 = vector.load %arg6[%c0_14, %c0_15] : memref<1x128xf32, #tpu.memory_space<vmem>>, vector<1x128xf32>
      %20 = vector.broadcast %19 : vector<1x128xf32> to vector<16x128xf32>
      %21 = arith.mulf %18, %20 : vector<16x128xf32>
      %c0_16 = arith.constant 0 : index
      %c0_17 = arith.constant 0 : index
      %22 = vector.load %arg7[%c0_16, %c0_17] : memref<1x128xf32, #tpu.memory_space<vmem>>, vector<1x128xf32>
      %23 = vector.broadcast %22 : vector<1x128xf32> to vector<16x128xf32>
      %24 = arith.addf %21, %23 : vector<16x128xf32>
      %c0_18 = arith.constant 0 : index
      %c0_19 = arith.constant 0 : index
      %25 = vector.load %arg8[%c0_18, %c0_19] : memref<16x128xf32, #tpu.memory_space<vmem>>, vector<16x128xf32>
      tpu.vector_store %arg8[%c0_18, %c0_19], %24 {strides = array<i32>} : memref<16x128xf32, #tpu.memory_space<vmem>>, vector<16x128xf32>,
    } else {
    }
    return
  }
  func.func @transform_0(%arg0: i32, %arg1: i32, %arg2: i32) -> i32 {
    %c0_i32 = arith.constant 0 : i32
    %c0_i32_0 = arith.constant 0 : i32
    return %c0_i32 : i32
  }
  func.func @transform_1(%arg0: i32, %arg1: i32, %arg2: i32) -> (i32, i32) {
    %c0_i32 = arith.constant 0 : i32
    %0 = arith.cmpi eq, %arg1, %c0_i32 : i32
    %c0_i32_0 = arith.constant 0 : i32
    %1 = arith.select %0, %arg2, %c0_i32_0 : i32
    %c0_i32_1 = arith.constant 0 : i32
    return %arg0, %1 : i32, i32
  }
  func.func @transform_2(%arg0: i32, %arg1: i32, %arg2: i32) -> (i32, i32) {
    %c0_i32 = arith.constant 0 : i32
    return %arg2, %arg1 : i32, i32
  }
  func.func @transform_3(%arg0: i32, %arg1: i32, %arg2: i32) -> (i32, i32) {
    %c0_i32 = arith.constant 0 : i32
    %c0_i32_0 = arith.constant 0 : i32
    return %c0_i32, %arg1 : i32, i32
  }
  func.func @transform_4(%arg0: i32, %arg1: i32, %arg2: i32) -> (i32, i32) {
    %c0_i32 = arith.constant 0 : i32
    %c0_i32_0 = arith.constant 0 : i32
    return %c0_i32, %arg1 : i32, i32
  }
  func.func @transform_5(%arg0: i32, %arg1: i32, %arg2: i32) -> (i32, i32) {
    %c0_i32 = arith.constant 0 : i32
    return %arg0, %arg1 : i32, i32
  }
}

</mosaic_0001>

<bundles_post_ra>
// kernel: tpu_custom_call.1
= control target key start
LH: loop header
LB: loop body
LE: loop exit
PB: predicated region body
PF: predicated region fallthrough
CT: control target
= control target key end

     0   :  { %11 = vsyncpa [#allocation6], 0  ;;  %s395_s0 = inlined_call_operand.<no memory space> [shape: f32[1], index: 0, kind: input, shape index: {}]   ;;  %s396_s1 = inlined_call_operand.hbm [shape: f32[16,128], index: 1, kind: input, shape index: {}]   ;;  %s397_s2 = inlined_call_operand.hbm [shape: s8[128,128], index: 2, kind: input, shape index: {}]   ;;  %s398_s3 = inlined_call_operand.vmem [shape: f32[1,128], index: 3, kind: input, shape index: {}]   ;;  %s399_s4 = inlined_call_operand.vmem [shape: f32[1,128], index: 4, kind: input, shape index: {}]   ;;  %s400_s5 = inlined_call_operand.hbm [shape: f32[16,128], index: 5, kind: output, shape index: {}]  }
   0x1   :  { %12 = vsyncpa [#allocation9], 0 }
   0x2   :  { %13 = vsyncpa [#allocation7], 0  ;;  %s331_s18 = smov [#allocation5]  }
   0x3   :  { %s25_s19 = sshll.u32 %s331_s18, 4  ;;  %s26_s19 = int_to_ptr.vmem [resolvable:$true] %s25_s19 }
   0x4   :  { %s273_s20 = scalar_lea.vmem %s26_s19, 256  ;;  %p278_p1 = scmp.lt.s32.totalorder %s26_s19, %s26_s19 }
   0x5   :  { %p274_p0 = scmp.ne.s32.totalorder %s26_s19, %s273_s20  ;;  %p279_p2 = scmp.lt.s32.totalorder %s273_s20, %s273_s20 }
   0x7   :  { %p280_p3 = por %p279_p2, %p278_p1 }
   0x9   :  { %p281_p4 = pnand %p280_p3, %p274_p0 }
   0xb   :  { %284 = shalt.err (!%p281_p4)
}
   0xc   :  { %s332_s21 = smov 128   ;;  %s333_s22 = smov 8  }
   0xd   :  { %31 = dma.hbm_to_vmem [thread:$0]  %s396_s1, 256, %s26_s19, [#allocation6], %s332_s21, %s332_s21, %s333_s22  }
   0xe   :  { %s334_s25 = smov [#allocation8]  }
   0xf   :  { %s37_s26 = sshll.u32 %s334_s25, 4  ;;  %s38_s26 = int_to_ptr.vmem [resolvable:$true] %s37_s26 }
  0x10   :  { %s293_s27 = scalar_lea.vmem %s38_s26, 512  ;;  %p298_p6 = scmp.lt.s32.totalorder %s38_s26, %s38_s26 }
  0x11   :  { %p294_p5 = scmp.ne.s32.totalorder %s38_s26, %s293_s27  ;;  %p299_p7 = scmp.lt.s32.totalorder %s293_s27, %s293_s27 }
  0x13   :  { %p300_p8 = por %p299_p7, %p298_p6 }
  0x15   :  { %p301_p9 = pnand %p300_p8, %p294_p5 }
  0x17   :  { %304 = shalt.err (!%p301_p9)
}
  0x18   :  { %43 = dma.hbm_to_vmem [thread:$0]  %s397_s2, 512, %s38_s26, [#allocation9], %s332_s21, %s332_s21, %s333_s22  }
  0x19   :  { %325 = dma.done.wait [#allocation6], 256  }
  0x1a   :  { %326 = vsyncadd [#allocation6], 4294967040 }
  0x1b   :  { %327 = dma.done.wait [#allocation9], 512  }
  0x1c   :  { %328 = vsyncadd [#allocation9], 4294966784  ;;  %v70_v0 = vstv %s395_s0  ;;  %v335_v1 = vmov 0.0   ;;  %vm336_vm0 = vmmov 0   ;;  %v107_v2 = vld [vmem:[#allocation8 + $0x18] sm:$0xff]  ;;  %v106_v5 = vld [vmem:[#allocation8 + $0x10] sm:$0xff] }
  0x1d   :  { %235 = vmatprep.subr.bf16.mxu0 %v335_v1  ;;  %251 = vmatprep.mubr.msk.bf16.mxu0 %vm336_vm0, %v335_v1  ;;  %263 = vrcp.f32 %v70_v0  ;;  %v117_v3 = vunpack.c.h.s8.bf16 %v107_v2  ;;  %v116_v4 = vunpack.c.l.s8.bf16 %v107_v2  ;;  %v68_v6 = vld [vmem:[#allocation5] sm:$0xff]  ;;  %v69_v7 = vld [vmem:[#allocation5 + $0x8] sm:$0xff]  ;;  %v115_v9 = vunpack.c.h.s8.bf16 %v106_v5  ;;  %v105_v15 = vld [vmem:[#allocation8 + $0x8] sm:$0xff]  ;;  %s337_s8 = smov [#allocation10]  }
  0x1e   :  { %v114_v14 = vunpack.c.l.s8.bf16 %v106_v5  ;;  %v113_v20 = vunpack.c.h.s8.bf16 %v105_v15  ;;  %v112_v26 = vunpack.c.l.s8.bf16 %v105_v15  ;;  %v104_v27 = vld [vmem:[#allocation8] sm:$0xff]  ;;  %v217_v31 = vld [vmem:[%s398_s3] ss:$0 sm:$0xff]  ;;  %s199_s9 = sshll.u32 %s337_s8, 4  ;;  %s200_s9 = int_to_ptr.vmem [resolvable:$true] %s199_s9 }
  0x1f   :  { %236 = vmatpush3.bf16.msra.mxu0 %v117_v3  ;;  %v111_v28 = vunpack.c.h.s8.bf16 %v104_v27  ;;  %v110_v29 = vunpack.c.l.s8.bf16 %v104_v27  ;;  %v218_v33 = vld [vmem:[%s399_s4] ss:$0 sm:$0xff]  ;;  %s305_s10 = scalar_lea.vmem %s200_s9, 256  ;;  %p310_p11 = scmp.lt.s32.totalorder %s200_s9, %s200_s9 }
  0x20   :  { %237 = vmatprep.subr.bf16.mxu0 %v335_v1  ;;  %p306_p10 = scmp.ne.s32.totalorder %s200_s9, %s305_s10  ;;  %p311_p12 = scmp.lt.s32.totalorder %s305_s10, %s305_s10 }
  0x22   :  { %p312_p13 = por %p311_p12, %p310_p11 }
  0x23   :  { %238 = vmatpush3.bf16.msra.mxu0 %v116_v4 }
  0x24   :  { %239 = vmatprep.subr.bf16.mxu0 %v335_v1  ;;  %p313_p0 = pnand %p312_p13, %p306_p10 }
  0x27   :  { %240 = vmatpush3.bf16.msra.mxu0 %v115_v9 }
  0x28   :  { %241 = vmatprep.subr.bf16.mxu0 %v335_v1 }
  0x2a   :  { %v264_v8 = vpop.eup %263 }
  0x2b   :  { %v72_v10 = vmul.f32 %v264_v8, %v68_v6  ;;  %v73_v11 = vmul.f32 %v264_v8, %v69_v7  ;;  %242 = vmatpush3.bf16.msra.mxu0 %v114_v14 }
  0x2c   :  { %243 = vmatprep.subr.bf16.mxu0 %v335_v1 }
  0x2d   :  { %v74_v12 = vmax.f32 %v72_v10, -128.0  ;;  %v75_v13 = vmax.f32 %v73_v11, -128.0 }
  0x2f   :  { %v76_v16 = vmin.f32 %v74_v12, 127.0  ;;  %v77_v17 = vmin.f32 %v75_v13, 127.0  ;;  %244 = vmatpush3.bf16.msra.mxu0 %v113_v20 }
  0x30   :  { %245 = vmatprep.subr.bf16.mxu0 %v335_v1 }
  0x31   :  { %vm78_vm1 = vcmp.lt.f32.partialorder %v76_v16, 0.0  ;;  %vm79_vm2 = vcmp.lt.f32.partialorder %v77_v17, 0.0  ;;  %v80_v18 = vceil.f32 %v76_v16  ;;  %v81_v19 = vceil.f32 %v77_v17 }
  0x32   :  { %v82_v21 = vfloor.f32 %v76_v16  ;;  %v83_v22 = vfloor.f32 %v77_v17 }
  0x33   :  { %246 = vmatpush3.bf16.msra.mxu0 %v112_v26 }
  0x34   :  { %v84_v23 = vsel %vm78_vm1, %v80_v18, %v82_v21  ;;  %v85_v24 = vsel %vm79_vm2, %v81_v19, %v83_v22  ;;  %247 = vmatprep.subr.bf16.mxu0 %v335_v1 }
  0x35   :  { %v224_v25 = vpack.c.bf16 %v85_v24, %v84_v23 }
  0x37   :  { %225 = vst [vmem:[#allocation3] sm:$0xff] %v224_v25   ;;  %248 = vmatpush3.bf16.msra.mxu0 %v111_v28 }
  0x38   :  { %249 = vmatprep.subr.bf16.mxu0 %v335_v1 }
  0x3b   :  { %250 = vmatpush3.bf16.msra.mxu0 %v110_v29 }
  0x3e   :  { %v262_v30 = vld [vmem:[#allocation3] sm:$0xff]  }
  0x3f   :  { %252 = vmatmul.mubr.bf16.vlgmr.msra.gmra.mxu0 %v262_v30 }
  0xff   :  { %v158_v32 = vpop.f32.mrf.mxu0 }
 0x100   :  { %v181_v34 = vmul.f32 %v217_v31, %v158_v32 }
 0x101   :  { %v253_v35 = vpop.f32.mrf.mxu0 }
 0x102   :  { %v190_v36 = vadd.f32 %v218_v33, %v181_v34 }
 0x103   :  { %v161_v37 = vpop.f32.mrf.mxu0 }
 0x104   :  { %192 = vst [vmem:[#allocation10] sm:$0xff] %v190_v36  ;;  %v182_v38 = vmul.f32 %v217_v31, %v161_v37 }
 0x105   :  { %v254_v39 = vpop.f32.mrf.mxu0 }
 0x106   :  { %v191_v40 = vadd.f32 %v218_v33, %v182_v38 }
 0x108   :  { %193 = vst [vmem:[#allocation10 + $0x8] sm:$0xff] %v191_v40 }
 0x109   :  { %316 = shalt.err (!%p313_p0)
}
 0x10a   :  { %205 = dma.vmem_to_hbm [thread:$0]  %s200_s9, 256, %s400_s5, [#allocation7], %s332_s21, %s332_s21, %s333_s22  }
 0x10b   :  { %329 = dma.done.wait [#allocation7], 256  }
 0x10c   :  { %330 = vsyncadd [#allocation7], 4294967040 }
 0x10d   :  { %209 = vsyncpa [#allocation6], 1 }
 0x10e   :  { %210 = vsyncpa [#allocation9], 1 }
 0x10f   :  { %211 = vsyncpa [#allocation7], 1 }

</bundles_post_ra>
